<compile_context>
chip_gen: v7x
topology: tpu7x:2x2x1
jax: 0.10.0
libtpu: 0.0.40
codegen_flags: <defaults>
</compile_context>

<pallas_src>
import numpy as np
import jax
import jax.numpy as jnp
from jax.experimental import pallas as pl
from jax.experimental.pallas import tpu as pltpu


def make_sinusoid_table(n_position: int, d_hid: int,
                        dtype=jnp.float32) -> jnp.ndarray:
    """Sinusoid position-encoding table; identical math to the PyTorch
    _get_sinusoid_encoding_table (float64 build, then cast).

    Pass dtype=model dtype (e.g. bf16) so the wrapper never re-converts the
    table per call."""
    pos = np.arange(n_position, dtype=np.float64)[:, None]            # (P, 1)
    hid = np.arange(d_hid, dtype=np.float64)[None, :]                 # (1, D)
    angle_rates = 1.0 / np.power(10000.0, 2.0 * (hid // 2) / d_hid)   # (1, D)
    table = pos * angle_rates                                         # (P, D)
    table[:, 0::2] = np.sin(table[:, 0::2])
    table[:, 1::2] = np.cos(table[:, 1::2])
    return jnp.asarray(table[None, :, :], dtype=dtype)                # (1, P, D)


def _add_pe_kernel(x_ref, pe_ref, o_ref):
    # x_ref: (1, rows, 128) or (Bb, R, 128); pe_ref: (rows, 128) / (R, 128).
    # Broadcast add over the leading (batch) dim; lane-dense store.
    o_ref[...] = x_ref[...] + pe_ref[...]


def positional_encoding(x: jnp.ndarray,
                        pos_table: jnp.ndarray,
                        *,
                        block_bytes: int = 4 << 20,   # ~4 MiB x-block per grid step
                        force_pallas: bool = False) -> jnp.ndarray:
    """x: (B, S, D); pos_table: (1, n_position, D). Returns x + pos_table[:, :S]."""
    B, S, D = x.shape
    pe = pos_table[:, :S, :]
    if pe.dtype != x.dtype:
        # Prefer storing the table pre-cast (make_sinusoid_table(dtype=...)) so
        # this convert pass over S*D never runs per call.
        pe = pe.astype(x.dtype)

    F = S * D
    itemsize = jnp.dtype(x.dtype).itemsize

    # Fallback: flattened axis not lane-alignable, or problem too small to be
    # worth a custom-call + per-grid-step overhead (XLA will fuse the add).
    if (F % 128 != 0) or (not force_pallas and x.size * itemsize < (1 << 20)):
        return x + pe

    R = F // 128                                       # lane-dense row count
    sublane = max(8, 32 // itemsize)                   # 8 f32 / 16 bf16 / 32 int8
    rows_per_block = (block_bytes // (128 * itemsize)) // sublane * sublane
    rows_per_block = max(sublane, rows_per_block)

    xf = x.reshape(B, R, 128)
    pef = pe.reshape(R, 128)

    if R > rows_per_block:
        # Path A: chunk the row axis; batch innermost -> shared PE tile reuse.
        rows = rows_per_block
        grid = (pl.cdiv(R, rows), B)
        in_specs = [
            pl.BlockSpec((1, rows, 128), lambda r, b: (b, r, 0)),   # per-batch x tile
            pl.BlockSpec((rows, 128),    lambda r, b: (r, 0)),      # shared PE tile
        ]
        out_specs = pl.BlockSpec((1, rows, 128), lambda r, b: (b, r, 0))
        dim_sem = ("parallel", "parallel")
        x_block_bytes = rows * 128 * itemsize
        pe_block_bytes = rows * 128 * itemsize
    else:
        # Path B: small R -> fold several batch elements into one block so each
        # grid step still moves ~block_bytes (avoids step-overhead regime).
        Bb = max(1, min(B, rows_per_block // R))
        grid = (pl.cdiv(B, Bb),)
        in_specs = [
            pl.BlockSpec((Bb, R, 128), lambda b: (b, 0, 0)),
            pl.BlockSpec((R, 128),     lambda b: (0, 0)),           # shared PE tile
        ]
        out_specs = pl.BlockSpec((Bb, R, 128), lambda b: (b, 0, 0))
        dim_sem = ("parallel",)
        x_block_bytes = Bb * R * 128 * itemsize
        pe_block_bytes = R * 128 * itemsize

    # Explicit VMEM budget: (x + out) double-buffered + PE double-buffered,
    # plus headroom for compiler scratch.  ~26 MiB at the 4 MiB default block,
    # which fits physical VMEM on v5e/v6e (128 MiB) and v7x (64 MiB/TC).
    vmem_budget = 2 * (2 * x_block_bytes + pe_block_bytes) + (2 << 20)

    out = pl.pallas_call(
        _add_pe_kernel,
        out_shape=jax.ShapeDtypeStruct((B, R, 128), x.dtype),
        grid_spec=pl.GridSpec(
            grid=grid,
            in_specs=in_specs,
            out_specs=out_specs,
        ),
        compiler_params=pltpu.CompilerParams(
            dimension_semantics=dim_sem,
            vmem_limit_bytes=int(vmem_budget),
        ),
    )(xf, pef)

    return out.reshape(B, S, D)


if __name__ == "__main__":
    key = jax.random.PRNGKey(0)
    k1, k2 = jax.random.split(key)

    # --- Test 1: small shape, exercises the batch-blocking path (Path B) ----
    B, S, D = 2, 8, 32
    n_position = 200
    x = jax.random.normal(k1, (B, S, D), dtype=jnp.float32)
    pos_table = make_sinusoid_table(n_position, D, dtype=jnp.float32)

    out = positional_encoding(x, pos_table, force_pallas=True)
    out = jax.block_until_ready(out)
    ref = x + pos_table[:, :S, :]
    np.testing.assert_allclose(np.asarray(out), np.asarray(ref),
                               rtol=1e-6, atol=1e-6)

    # --- Test 2: small block_bytes override exercises the row-chunk path ----
    B2, S2, D2 = 2, 8, 256                       # R = 16 rows of 128 lanes
    x2 = jax.random.normal(k2, (B2, S2, D2), dtype=jnp.float32)
    pos_table2 = make_sinusoid_table(n_position, D2, dtype=jnp.float32)

    out2 = positional_encoding(x2, pos_table2,
                               block_bytes=8 * 128 * 4,   # 8-row blocks -> Path A
                               force_pallas=True)
    out2 = jax.block_until_ready(out2)
    ref2 = x2 + pos_table2[:, :S2, :]
    np.testing.assert_allclose(np.asarray(out2), np.asarray(ref2),
                               rtol=1e-6, atol=1e-6)

    print("KERNEL_OK")
</pallas_src>

<mosaic_0001>
module attributes {stable_mosaic.version = 11 : i64} {
  func.func @_add_pe_kernel(%arg0: i32, %arg1: memref<2x2x128xf32, #tpu.memory_space<vmem>>, %arg2: memref<2x128xf32, #tpu.memory_space<vmem>>, %arg3: memref<2x2x128xf32, #tpu.memory_space<vmem>>) attributes {dimension_semantics = [#tpu.dimension_semantics<parallel>], iteration_bounds = array<i64: 1>, scalar_prefetch = 0 : i64, scratch_operands = 0 : i64, tpu.core_type = #tpu.core_type<tc>, window_params = [{transform_indices = @transform_0, window_bounds = array<i64: 2, 2, 128>}, {pipeline_mode = #tpu.pipeline_mode<synchronous>, transform_indices = @transform_1, window_bounds = array<i64: 2, 128>}, {transform_indices = @transform_2, window_bounds = array<i64: 2, 2, 128>}]} {
    %c0 = arith.constant 0 : index
    %c0_0 = arith.constant 0 : index
    %c0_1 = arith.constant 0 : index
    %0 = vector.load %arg1[%c0, %c0_0, %c0_1] : memref<2x2x128xf32, #tpu.memory_space<vmem>>, vector<2x2x128xf32>
    %c0_2 = arith.constant 0 : index
    %c0_3 = arith.constant 0 : index
    %1 = vector.load %arg2[%c0_2, %c0_3] : memref<2x128xf32, #tpu.memory_space<vmem>>, vector<2x128xf32>
    %2 = vector.shape_cast %1 : vector<2x128xf32> to vector<1x2x128xf32>
    %3 = vector.broadcast %2 : vector<1x2x128xf32> to vector<2x2x128xf32>
    %4 = arith.addf %0, %3 : vector<2x2x128xf32>
    %c0_4 = arith.constant 0 : index
    %c0_5 = arith.constant 0 : index
    %c0_6 = arith.constant 0 : index
    %5 = vector.load %arg3[%c0_4, %c0_5, %c0_6] : memref<2x2x128xf32, #tpu.memory_space<vmem>>, vector<2x2x128xf32>
    tpu.vector_store %arg3[%c0_4, %c0_5, %c0_6], %4 {strides = array<i32>} : memref<2x2x128xf32, #tpu.memory_space<vmem>>, vector<2x2x128xf32>,
    return
  }
  func.func @transform_0(%arg0: i32) -> (i32, i32, i32) {
    %c0_i32 = arith.constant 0 : i32
    %c0_i32_0 = arith.constant 0 : i32
    %c0_i32_1 = arith.constant 0 : i32
    return %arg0, %c0_i32, %c0_i32_0 : i32, i32, i32
  }
  func.func @transform_1(%arg0: i32) -> (i32, i32) {
    %c0_i32 = arith.constant 0 : i32
    %c0_i32_0 = arith.constant 0 : i32
    %c0_i32_1 = arith.constant 0 : i32
    return %c0_i32, %c0_i32_0 : i32, i32
  }
  func.func @transform_2(%arg0: i32) -> (i32, i32, i32) {
    %c0_i32 = arith.constant 0 : i32
    %c0_i32_0 = arith.constant 0 : i32
    %c0_i32_1 = arith.constant 0 : i32
    return %arg0, %c0_i32, %c0_i32_0 : i32, i32, i32
  }
}

</mosaic_0001>

<bundles_post_ra>
// kernel: tpu_custom_call.1
= control target key start
LH: loop header
LB: loop body
LE: loop exit
PB: predicated region body
PF: predicated region fallthrough
CT: control target
= control target key end

     0   :  { %7 = vsyncpa [#allocation3], 0  ;;  %s154_s0 = inlined_call_operand.hbm [shape: f32[2,2,128], index: 0, kind: input, shape index: {}]   ;;  %s155_s1 = inlined_call_operand.vmem [shape: f32[2,128], index: 1, kind: input, shape index: {}]   ;;  %s156_s2 = inlined_call_operand.hbm [shape: f32[2,2,128], index: 2, kind: output, shape index: {}]  }
   0x1   :  { %8 = vsyncpa [#allocation4], 0  ;;  %s102_s9 = smov [#allocation2]   ;;  %s54_s13 = scalar_lea.hbm %s154_s0, 64 }
   0x2   :  { %s14_s10 = sshll.u32 %s102_s9, 4  ;;  %p55_p0 = scmp.ne.s32.totalorder %s154_s0, %s54_s13  ;;  %s15_s10 = int_to_ptr.vmem [resolvable:$true] %s14_s10 }
   0x3   :  { %p58_p1 = scmp.lt.u32.totalorder %s54_s13, %s154_s0 }
   0x5   :  { %p60_p2 = pnand %p58_p1, %p55_p0 }
   0x7   :  { %63 = shalt.err (!%p60_p2)
}
   0x8   :  { %s64_s18 = scalar_lea.vmem %s15_s10, 64  ;;  %p69_p4 = scmp.lt.s32.totalorder %s15_s10, %s15_s10 }
   0x9   :  { %p65_p3 = scmp.ne.s32.totalorder %s15_s10, %s64_s18  ;;  %p70_p5 = scmp.lt.s32.totalorder %s64_s18, %s64_s18 }
   0xb   :  { %p71_p6 = por %p70_p5, %p69_p4 }
   0xd   :  { %p72_p7 = pnand %p71_p6, %p65_p3 }
   0xf   :  { %75 = shalt.err (!%p72_p7)
}
  0x10   :  { %s103_s19 = smov 32   ;;  %s104_s20 = smov 2  }
  0x11   :  { %20 = dma.hbm_to_vmem [thread:$0]  %s154_s0, 64, %s15_s10, [#allocation3], %s103_s19, %s103_s19, %s104_s20  }
  0x12   :  { %98 = dma.done.wait [#allocation3], 64  }
  0x13   :  { %99 = vsyncadd [#allocation3], 4294967232  ;;  %s105_s23 = smov [#allocation5]   ;;  %v26_v0 = vld [vmem:[#allocation2] sm:$0x3] }
  0x14   :  { %s38_s24 = sshll.u32 %s105_s23, 4  ;;  %v28_v1 = vld [vmem:[%s155_s1] sm:$0x3]  ;;  %v27_v2 = vld [vmem:[#allocation2 + $0x2] sm:$0x3]  ;;  %s39_s24 = int_to_ptr.vmem [resolvable:$true] %s38_s24 }
  0x15   :  { %v29_v3 = vadd.f32 %v28_v1, %v26_v0  ;;  %v30_v4 = vadd.f32 %v28_v1, %v27_v2  ;;  %s76_s27 = scalar_lea.vmem %s39_s24, 64  ;;  %p81_p9 = scmp.lt.s32.totalorder %s39_s24, %s39_s24 }
  0x16   :  { %p77_p8 = scmp.ne.s32.totalorder %s39_s24, %s76_s27  ;;  %p82_p10 = scmp.lt.s32.totalorder %s76_s27, %s76_s27 }
  0x17   :  { %31 = vst [vmem:[#allocation5] sm:$0x3] %v29_v3  ;;  %32 = vst [vmem:[#allocation5 + $0x2] sm:$0x3] %v30_v4 }
  0x18   :  { %p83_p11 = por %p82_p10, %p81_p9 }
  0x1a   :  { %p84_p12 = pnand %p83_p11, %p77_p8 }
  0x1c   :  { %87 = shalt.err (!%p84_p12)
}
  0x1d   :  { %s88_s29 = scalar_lea.hbm %s156_s2, 64 }
  0x1e   :  { %p89_p13 = scmp.ne.s32.totalorder %s156_s2, %s88_s29  ;;  %p92_p0 = scmp.lt.u32.totalorder %s88_s29, %s156_s2 }
  0x20   :  { %p94_p1 = pnand %p92_p0, %p89_p13 }
  0x22   :  { %97 = shalt.err (!%p94_p1)
}
  0x23   :  { %44 = dma.vmem_to_hbm [thread:$0]  %s39_s24, 64, %s156_s2, [#allocation4], %s103_s19, %s103_s19, %s104_s20  }
  0x24   :  { %100 = dma.done.wait [#allocation4], 64  }
  0x25   :  { %101 = vsyncadd [#allocation4], 4294967232 }
  0x26   :  { %48 = vsyncpa [#allocation3], 1 }
  0x27   :  { %49 = vsyncpa [#allocation4], 1 }

</bundles_post_ra>
